<compile_context>
chip_gen: v7x
topology: tpu7x:2x2x1
jax: 0.10.0
libtpu: 0.0.40
codegen_flags: <defaults>
</compile_context>

<pallas_src>
import functools

import numpy as np
import jax
import jax.numpy as jnp
from jax.experimental import pallas as pl
from jax.experimental.pallas import tpu as pltpu

EMBED = 32          # embed_size
HIDDEN = 32         # hidden_size
VOCAB = 40          # vocab_size
GATE = 4 * HIDDEN   # 128 = one vreg lane width (i|f|g|o gate blocks)
B_PAD = 8           # batch padded to one sublane group

# Weight-slab row offsets (all multiples of 8 -> sublane-aligned slices).
_OFF_BIAS = 0                        # rows 0:8    row0 = b_ih+b_hh, row1 = b_lin (lane padded)
_OFF_WIH = 8                         # rows 8:40   W_ih^T   (E, 4H)
_OFF_WHH = _OFF_WIH + EMBED          # rows 40:72  W_hh^T   (H, 4H)
_OFF_EMB = _OFF_WHH + HIDDEN         # rows 72:112 emb_proj (V, 4H) = table @ W_ih^T + gate bias
_OFF_WLIN = _OFF_EMB + VOCAB         # rows 112:144 W_lin^T (H, 4H) lane-padded V -> 4H
_SLAB_ROWS = _OFF_WLIN + HIDDEN      # 144


# ---------------------------------------------------------------------------
# Fused kernel: embedding + input projection + LSTM recurrence + packed
# selection + vocab projection, single grid step.
# ---------------------------------------------------------------------------
def _make_decoder_kernel(T):
    T1 = T + 1
    H = HIDDEN
    V = VOCAB

    def kernel(caps_ref, feat_ref, slab_ref, sel_ref, out_ref):
        # ---- static, sublane-aligned views of the coalesced weight slab ----
        gate_b = slab_ref[_OFF_BIAS:_OFF_BIAS + 1, :]          # (1, 4H)
        lin_b = slab_ref[_OFF_BIAS + 1:_OFF_BIAS + 2, :]       # (1, 4H)
        w_ih = slab_ref[_OFF_WIH:_OFF_WIH + EMBED, :]          # (E, 4H)
        w_hh = slab_ref[_OFF_WHH:_OFF_WHH + H, :]              # (H, 4H)
        emb_proj = slab_ref[_OFF_EMB:_OFF_EMB + V, :]          # (V, 4H)
        w_lin = slab_ref[_OFF_WLIN:_OFF_WLIN + H, :]           # (H, 4H)

        caps = caps_ref[...]                                   # (B_PAD, T) int32
        feats = feat_ref[...]                                  # (B_PAD, E) f32

        # ---- hoisted input projection for ALL timesteps (off the serial
        #      path).  Embedding lookup is folded into the matmul:
        #      one_hot(token) @ (table @ W_ih + bias).  Each block is
        #      (8, 4H) -> 8-row sublane aligned, no unaligned slicing later.
        lane_iota = jax.lax.broadcasted_iota(jnp.int32, (B_PAD, V), 1)
        gx = [jnp.dot(feats, w_ih, preferred_element_type=jnp.float32) + gate_b]
        for t in range(T):                                     # static unroll
            one_hot = (caps[:, t:t + 1] == lane_iota).astype(jnp.float32)
            gx.append(jnp.dot(one_hot, emb_proj,
                              preferred_element_type=jnp.float32))

        # ---- LSTM recurrence: per step only h @ W_hh + 2 full-width EUP
        #      activations (+ tanh(c)) sit on the serial critical path. ------
        h = jnp.zeros((B_PAD, H), jnp.float32)
        c = jnp.zeros((B_PAD, H), jnp.float32)
        hs = []
        for t in range(T1):                                    # static unroll
            gates = gx[t] + jnp.dot(h, w_hh,
                                    preferred_element_type=jnp.float32)
            sig = jax.nn.sigmoid(gates)     # full 128-lane EUP call (i, f, o)
            th = jnp.tanh(gates)            # full 128-lane EUP call (g)
            # PyTorch gate order: i, f, g, o
            c = sig[:, H:2 * H] * c + sig[:, 0:H] * th[:, 2 * H:3 * H]
            h = sig[:, 3 * H:4 * H] * jnp.tanh(c)
            hs.append(h)

        # ---- packed-row selection + lane-dense vocab projection, fused -----
        h_all = jnp.concatenate(hs, axis=0)                    # (T1*B_PAD, H)
        packed_h = jnp.dot(sel_ref[...], h_all,
                           preferred_element_type=jnp.float32)  # (N_pad, H)
        out_ref[...] = jnp.dot(packed_h, w_lin,
                               preferred_element_type=jnp.float32) + lin_b

    return kernel


def run_decoder(caps_pad, feat_pad, slab, sel):
    T = caps_pad.shape[1]
    n_pad = sel.shape[0]
    kernel = _make_decoder_kernel(T)
    return pl.pallas_call(
        kernel,
        out_shape=jax.ShapeDtypeStruct((n_pad, GATE), jnp.float32),
        grid_spec=pltpu.PrefetchScalarGridSpec(
            num_scalar_prefetch=0,
            grid=(1,),                                   # single kernel step
            in_specs=[
                pl.BlockSpec(caps_pad.shape, lambda i: (0, 0)),
                pl.BlockSpec(feat_pad.shape, lambda i: (0, 0)),
                pl.BlockSpec(slab.shape, lambda i: (0, 0)),
                pl.BlockSpec(sel.shape, lambda i: (0, 0)),
            ],
            out_specs=pl.BlockSpec((n_pad, GATE), lambda i: (0, 0)),
        ),
        compiler_params=pltpu.CompilerParams(
            dimension_semantics=("arbitrary",)),
    )(caps_pad, feat_pad, slab, sel)


# ---------------------------------------------------------------------------
# One-time parameter packing (review: precompute derived params at setup and
# coalesce the six tiny kernel inputs into one contiguous slab).
# ---------------------------------------------------------------------------
def prepare_params(params):
    assert GATE == 128, "slab layout assumes 4*hidden_size == 128 lanes"
    gate_b = (params["b_ih"] + params["b_hh"]).reshape(1, GATE)
    lin_b = jnp.pad(params["b_lin"], (0, GATE - VOCAB)).reshape(1, GATE)
    bias_block = jnp.concatenate(
        [gate_b, lin_b, jnp.zeros((6, GATE), jnp.float32)], axis=0)   # (8, 4H)
    # Embedding gather folded into the input projection.
    emb_proj = params["embedding"] @ params["w_ih_t"] + gate_b        # (V, 4H)
    w_lin_pad = jnp.pad(params["w_lin_t"], ((0, 0), (0, GATE - VOCAB)))
    slab = jnp.concatenate(
        [bias_block, params["w_ih_t"], params["w_hh_t"], emb_proj, w_lin_pad],
        axis=0).astype(jnp.float32)
    assert slab.shape == (_SLAB_ROWS, GATE)
    return {"slab": slab}


# ---------------------------------------------------------------------------
# pack_padded_sequence(..., batch_first=True, enforce_sorted=False) row order
# (host numpy on concrete lengths — matches PyTorch packed .data row order)
# ---------------------------------------------------------------------------
def packed_indices(lengths):
    lengths = np.asarray(lengths)
    order = np.argsort(-lengths, kind="stable")     # descending length, stable
    t_idx, b_idx = [], []
    for t in range(int(lengths.max())):
        for b in order:
            if lengths[b] > t:
                t_idx.append(t)
                b_idx.append(int(b))
    return np.array(t_idx, np.int32), np.array(b_idx, np.int32)


# ---------------------------------------------------------------------------
# DecoderRNN.forward
# ---------------------------------------------------------------------------
@functools.partial(jax.jit, static_argnames=("n",))
def _decoder_device(slab, features, captions, sel, n):
    B = features.shape[0]
    feat_pad = jnp.pad(features, ((0, B_PAD - B), (0, 0)))    # batch -> 8 rows
    caps_pad = jnp.pad(captions, ((0, B_PAD - B), (0, 0)))
    logits = run_decoder(caps_pad, feat_pad, slab, sel)        # (n_pad, 128)
    return logits[:n, :VOCAB]


def decoder_forward(prepared, features, captions, lengths):
    B, T = captions.shape
    lengths = np.asarray(lengths)
    assert B <= B_PAD and int(lengths.max()) <= T + 1
    # Packed-sequence selection as a one-hot matrix built on the host from the
    # concrete lengths (constant kernel input; no XLA gather HLOs).
    t_idx, b_idx = packed_indices(lengths)
    n = int(t_idx.shape[0])
    n_pad = -(-n // 8) * 8
    sel = np.zeros((n_pad, (T + 1) * B_PAD), np.float32)
    sel[np.arange(n), t_idx * B_PAD + b_idx] = 1.0
    return _decoder_device(prepared["slab"], features, captions,
                           jnp.asarray(sel), n)


# ---------------------------------------------------------------------------
# pure-JAX reference for validation
# ---------------------------------------------------------------------------
def reference_forward(params, features, captions, lengths):
    emb = jnp.take(params["embedding"], captions, axis=0)
    x = jnp.concatenate([features[:, None, :], emb], axis=1)
    B = x.shape[0]
    H = HIDDEN

    def step(carry, xt):
        h, c = carry
        gates = (xt @ params["w_ih_t"] + h @ params["w_hh_t"]
                 + params["b_ih"] + params["b_hh"])
        i = jax.nn.sigmoid(gates[:, :H])
        f = jax.nn.sigmoid(gates[:, H:2 * H])
        g = jnp.tanh(gates[:, 2 * H:3 * H])
        o = jax.nn.sigmoid(gates[:, 3 * H:])
        c = f * c + i * g
        h = o * jnp.tanh(c)
        return (h, c), h

    init = (jnp.zeros((B, H), jnp.float32), jnp.zeros((B, H), jnp.float32))
    _, hs = jax.lax.scan(step, init, jnp.transpose(x, (1, 0, 2)))
    t_idx, b_idx = packed_indices(lengths)
    packed_h = hs[t_idx, b_idx]
    return packed_h @ params["w_lin_t"] + params["b_lin"]


# ---------------------------------------------------------------------------
if __name__ == "__main__":
    B, T = 2, 8
    key = jax.random.PRNGKey(0)
    ks = jax.random.split(key, 10)

    params = {
        "embedding": jax.random.normal(ks[0], (VOCAB, EMBED), jnp.float32) * 0.1,
        # PyTorch stores weight_ih (4H, E) / weight_hh (4H, H); keep transposed.
        "w_ih_t": jax.random.normal(ks[1], (EMBED, 4 * HIDDEN), jnp.float32) * 0.1,
        "w_hh_t": jax.random.normal(ks[2], (HIDDEN, 4 * HIDDEN), jnp.float32) * 0.1,
        "b_ih": jax.random.normal(ks[3], (4 * HIDDEN,), jnp.float32) * 0.1,
        "b_hh": jax.random.normal(ks[4], (4 * HIDDEN,), jnp.float32) * 0.1,
        # nn.Linear weight is (V, H); keep transposed (H, V).
        "w_lin_t": jax.random.normal(ks[5], (HIDDEN, VOCAB), jnp.float32) * 0.1,
        "b_lin": jax.random.normal(ks[6], (VOCAB,), jnp.float32) * 0.1,
    }
    prepared = prepare_params(params)          # one-time derived-param packing

    features = jax.random.normal(ks[7], (B, EMBED), jnp.float32)
    captions = jax.random.randint(ks[8], (B, T), 0, VOCAB, dtype=jnp.int32)
    lengths = np.array([7, 5])                 # lengths <= T+1

    out = decoder_forward(prepared, features, captions, lengths)
    out = jax.block_until_ready(out)

    ref = reference_forward(params, features, captions, lengths)
    assert out.shape == (int(lengths.sum()), VOCAB), out.shape
    np.testing.assert_allclose(np.asarray(out), np.asarray(ref),
                               rtol=1e-4, atol=1e-4)
    print("KERNEL_OK")
</pallas_src>

<mosaic_0001>
module attributes {stable_mosaic.version = 11 : i64} {
  func.func @kernel(%arg0: i32, %arg1: memref<8x8xi32, #tpu.memory_space<vmem>>, %arg2: memref<8x32xf32, #tpu.memory_space<vmem>>, %arg3: memref<144x128xf32, #tpu.memory_space<vmem>>, %arg4: memref<16x72xf32, #tpu.memory_space<vmem>>, %arg5: memref<16x128xf32, #tpu.memory_space<vmem>>) attributes {dimension_semantics = [#tpu.dimension_semantics<arbitrary>], iteration_bounds = array<i64: 1>, scalar_prefetch = 0 : i64, scratch_operands = 0 : i64, tpu.core_type = #tpu.core_type<tc>, window_params = [{pipeline_mode = #tpu.pipeline_mode<synchronous>, transform_indices = @transform_0, window_bounds = array<i64: 8, 8>}, {pipeline_mode = #tpu.pipeline_mode<synchronous>, transform_indices = @transform_1, window_bounds = array<i64: 8, 32>}, {pipeline_mode = #tpu.pipeline_mode<synchronous>, transform_indices = @transform_2, window_bounds = array<i64: 144, 128>}, {pipeline_mode = #tpu.pipeline_mode<synchronous>, transform_indices = @transform_3, window_bounds = array<i64: 16, 72>}, {pipeline_mode = #tpu.pipeline_mode<synchronous>, transform_indices = @transform_4, window_bounds = array<i64: 16, 128>}]} {
    %c0 = arith.constant 0 : index
    %c0_0 = arith.constant 0 : index
    %0 = vector.load %arg3[%c0, %c0_0] : memref<144x128xf32, #tpu.memory_space<vmem>>, vector<1x128xf32>
    %c1 = arith.constant 1 : index
    %c0_1 = arith.constant 0 : index
    %1 = vector.load %arg3[%c1, %c0_1] : memref<144x128xf32, #tpu.memory_space<vmem>>, vector<1x128xf32>
    %c8 = arith.constant 8 : index
    %c0_2 = arith.constant 0 : index
    %2 = vector.load %arg3[%c8, %c0_2] : memref<144x128xf32, #tpu.memory_space<vmem>>, vector<32x128xf32>
    %c40 = arith.constant 40 : index
    %c0_3 = arith.constant 0 : index
    %3 = vector.load %arg3[%c40, %c0_3] : memref<144x128xf32, #tpu.memory_space<vmem>>, vector<32x128xf32>
    %c72 = arith.constant 72 : index
    %c0_4 = arith.constant 0 : index
    %4 = vector.load %arg3[%c72, %c0_4] : memref<144x128xf32, #tpu.memory_space<vmem>>, vector<40x128xf32>
    %c112 = arith.constant 112 : index
    %c0_5 = arith.constant 0 : index
    %5 = vector.load %arg3[%c112, %c0_5] : memref<144x128xf32, #tpu.memory_space<vmem>>, vector<32x128xf32>
    %c0_6 = arith.constant 0 : index
    %c0_7 = arith.constant 0 : index
    %6 = vector.load %arg1[%c0_6, %c0_7] : memref<8x8xi32, #tpu.memory_space<vmem>>, vector<8x8xi32>
    %c0_8 = arith.constant 0 : index
    %c0_9 = arith.constant 0 : index
    %7 = vector.load %arg2[%c0_8, %c0_9] : memref<8x32xf32, #tpu.memory_space<vmem>>, vector<8x32xf32>
    %8 = tpu.iota {dimensions = array<i32: 1>} : vector<8x40xi32>
    %cst = arith.constant dense<0.000000e+00> : vector<8x128xf32>
    %9 = tpu.matmul %7, %2, %cst {dimension_numbers = #tpu.dot_dimension_numbers<[1], [0], [0], [1], [0, 0, 1, 1], [], []>} : vector<8x32xf32>, vector<32x128xf32>, vector<8x128xf32> -> vector<8x128xf32>
    %10 = vector.broadcast %0 : vector<1x128xf32> to vector<8x128xf32>
    %11 = arith.addf %9, %10 : vector<8x128xf32>
    %12 = vector.extract_strided_slice %6 {offsets = [0, 0], sizes = [8, 1], strides = [1, 1]} : vector<8x8xi32> to vector<8x1xi32>
    %13 = vector.broadcast %12 : vector<8x1xi32> to vector<8x40xi32>
    %14 = arith.cmpi eq, %13, %8 : vector<8x40xi32>
    %15 = arith.extui %14 : vector<8x40xi1> to vector<8x40xi32>
    %16 = arith.sitofp %15 : vector<8x40xi32> to vector<8x40xf32>
    %cst_10 = arith.constant dense<0.000000e+00> : vector<8x128xf32>
    %17 = tpu.matmul %16, %4, %cst_10 {dimension_numbers = #tpu.dot_dimension_numbers<[1], [0], [0], [1], [0, 0, 1, 1], [], []>} : vector<8x40xf32>, vector<40x128xf32>, vector<8x128xf32> -> vector<8x128xf32>
    %18 = vector.extract_strided_slice %6 {offsets = [0, 1], sizes = [8, 1], strides = [1, 1]} : vector<8x8xi32> to vector<8x1xi32>
    %19 = vector.broadcast %18 : vector<8x1xi32> to vector<8x40xi32>
    %20 = arith.cmpi eq, %19, %8 : vector<8x40xi32>
    %21 = arith.extui %20 : vector<8x40xi1> to vector<8x40xi32>
    %22 = arith.sitofp %21 : vector<8x40xi32> to vector<8x40xf32>
    %cst_11 = arith.constant dense<0.000000e+00> : vector<8x128xf32>
    %23 = tpu.matmul %22, %4, %cst_11 {dimension_numbers = #tpu.dot_dimension_numbers<[1], [0], [0], [1], [0, 0, 1, 1], [], []>} : vector<8x40xf32>, vector<40x128xf32>, vector<8x128xf32> -> vector<8x128xf32>
    %24 = vector.extract_strided_slice %6 {offsets = [0, 2], sizes = [8, 1], strides = [1, 1]} : vector<8x8xi32> to vector<8x1xi32>
    %25 = vector.broadcast %24 : vector<8x1xi32> to vector<8x40xi32>
    %26 = arith.cmpi eq, %25, %8 : vector<8x40xi32>
    %27 = arith.extui %26 : vector<8x40xi1> to vector<8x40xi32>
    %28 = arith.sitofp %27 : vector<8x40xi32> to vector<8x40xf32>
    %cst_12 = arith.constant dense<0.000000e+00> : vector<8x128xf32>
    %29 = tpu.matmul %28, %4, %cst_12 {dimension_numbers = #tpu.dot_dimension_numbers<[1], [0], [0], [1], [0, 0, 1, 1], [], []>} : vector<8x40xf32>, vector<40x128xf32>, vector<8x128xf32> -> vector<8x128xf32>
    %30 = vector.extract_strided_slice %6 {offsets = [0, 3], sizes = [8, 1], strides = [1, 1]} : vector<8x8xi32> to vector<8x1xi32>
    %31 = vector.broadcast %30 : vector<8x1xi32> to vector<8x40xi32>
    %32 = arith.cmpi eq, %31, %8 : vector<8x40xi32>
    %33 = arith.extui %32 : vector<8x40xi1> to vector<8x40xi32>
    %34 = arith.sitofp %33 : vector<8x40xi32> to vector<8x40xf32>
    %cst_13 = arith.constant dense<0.000000e+00> : vector<8x128xf32>
    %35 = tpu.matmul %34, %4, %cst_13 {dimension_numbers = #tpu.dot_dimension_numbers<[1], [0], [0], [1], [0, 0, 1, 1], [], []>} : vector<8x40xf32>, vector<40x128xf32>, vector<8x128xf32> -> vector<8x128xf32>
    %36 = vector.extract_strided_slice %6 {offsets = [0, 4], sizes = [8, 1], strides = [1, 1]} : vector<8x8xi32> to vector<8x1xi32>
    %37 = vector.broadcast %36 : vector<8x1xi32> to vector<8x40xi32>
    %38 = arith.cmpi eq, %37, %8 : vector<8x40xi32>
    %39 = arith.extui %38 : vector<8x40xi1> to vector<8x40xi32>
    %40 = arith.sitofp %39 : vector<8x40xi32> to vector<8x40xf32>
    %cst_14 = arith.constant dense<0.000000e+00> : vector<8x128xf32>
    %41 = tpu.matmul %40, %4, %cst_14 {dimension_numbers = #tpu.dot_dimension_numbers<[1], [0], [0], [1], [0, 0, 1, 1], [], []>} : vector<8x40xf32>, vector<40x128xf32>, vector<8x128xf32> -> vector<8x128xf32>
    %42 = vector.extract_strided_slice %6 {offsets = [0, 5], sizes = [8, 1], strides = [1, 1]} : vector<8x8xi32> to vector<8x1xi32>
    %43 = vector.broadcast %42 : vector<8x1xi32> to vector<8x40xi32>
    %44 = arith.cmpi eq, %43, %8 : vector<8x40xi32>
    %45 = arith.extui %44 : vector<8x40xi1> to vector<8x40xi32>
    %46 = arith.sitofp %45 : vector<8x40xi32> to vector<8x40xf32>
    %cst_15 = arith.constant dense<0.000000e+00> : vector<8x128xf32>
    %47 = tpu.matmul %46, %4, %cst_15 {dimension_numbers = #tpu.dot_dimension_numbers<[1], [0], [0], [1], [0, 0, 1, 1], [], []>} : vector<8x40xf32>, vector<40x128xf32>, vector<8x128xf32> -> vector<8x128xf32>
    %48 = vector.extract_strided_slice %6 {offsets = [0, 6], sizes = [8, 1], strides = [1, 1]} : vector<8x8xi32> to vector<8x1xi32>
    %49 = vector.broadcast %48 : vector<8x1xi32> to vector<8x40xi32>
    %50 = arith.cmpi eq, %49, %8 : vector<8x40xi32>
    %51 = arith.extui %50 : vector<8x40xi1> to vector<8x40xi32>
    %52 = arith.sitofp %51 : vector<8x40xi32> to vector<8x40xf32>
    %cst_16 = arith.constant dense<0.000000e+00> : vector<8x128xf32>
    %53 = tpu.matmul %52, %4, %cst_16 {dimension_numbers = #tpu.dot_dimension_numbers<[1], [0], [0], [1], [0, 0, 1, 1], [], []>} : vector<8x40xf32>, vector<40x128xf32>, vector<8x128xf32> -> vector<8x128xf32>
    %54 = vector.extract_strided_slice %6 {offsets = [0, 7], sizes = [8, 1], strides = [1, 1]} : vector<8x8xi32> to vector<8x1xi32>
    %55 = vector.broadcast %54 : vector<8x1xi32> to vector<8x40xi32>
    %56 = arith.cmpi eq, %55, %8 : vector<8x40xi32>
    %57 = arith.extui %56 : vector<8x40xi1> to vector<8x40xi32>
    %58 = arith.sitofp %57 : vector<8x40xi32> to vector<8x40xf32>
    %cst_17 = arith.constant dense<0.000000e+00> : vector<8x128xf32>
    %59 = tpu.matmul %58, %4, %cst_17 {dimension_numbers = #tpu.dot_dimension_numbers<[1], [0], [0], [1], [0, 0, 1, 1], [], []>} : vector<8x40xf32>, vector<40x128xf32>, vector<8x128xf32> -> vector<8x128xf32>
    %cst_18 = arith.constant 0.000000e+00 : f32
    %60 = vector.broadcast %cst_18 : f32 to vector<8x32xf32>
    %cst_19 = arith.constant 0.000000e+00 : f32
    %61 = vector.broadcast %cst_19 : f32 to vector<8x32xf32>
    %cst_20 = arith.constant dense<0.000000e+00> : vector<8x128xf32>
    %62 = tpu.matmul %60, %3, %cst_20 {dimension_numbers = #tpu.dot_dimension_numbers<[1], [0], [0], [1], [0, 0, 1, 1], [], []>} : vector<8x32xf32>, vector<32x128xf32>, vector<8x128xf32> -> vector<8x128xf32>
    %63 = arith.addf %11, %62 : vector<8x128xf32>
    %64 = arith.negf %63 : vector<8x128xf32>
    %65 = math.exp %64 : vector<8x128xf32>
    %cst_21 = arith.constant 1.000000e+00 : f32
    %66 = vector.broadcast %cst_21 : f32 to vector<8x128xf32>
    %67 = arith.addf %66, %65 : vector<8x128xf32>
    %68 = arith.divf %66, %67 : vector<8x128xf32>
    %69 = math.tanh %63 : vector<8x128xf32>
    %70 = vector.extract_strided_slice %68 {offsets = [0, 32], sizes = [8, 32], strides = [1, 1]} : vector<8x128xf32> to vector<8x32xf32>
    %71 = arith.mulf %70, %61 : vector<8x32xf32>
    %72 = vector.extract_strided_slice %68 {offsets = [0, 0], sizes = [8, 32], strides = [1, 1]} : vector<8x128xf32> to vector<8x32xf32>
    %73 = vector.extract_strided_slice %69 {offsets = [0, 64], sizes = [8, 32], strides = [1, 1]} : vector<8x128xf32> to vector<8x32xf32>
    %74 = arith.mulf %72, %73 : vector<8x32xf32>
    %75 = arith.addf %71, %74 : vector<8x32xf32>
    %76 = vector.extract_strided_slice %68 {offsets = [0, 96], sizes = [8, 32], strides = [1, 1]} : vector<8x128xf32> to vector<8x32xf32>
    %77 = math.tanh %75 : vector<8x32xf32>
    %78 = arith.mulf %76, %77 : vector<8x32xf32>
    %cst_22 = arith.constant dense<0.000000e+00> : vector<8x128xf32>
    %79 = tpu.matmul %78, %3, %cst_22 {dimension_numbers = #tpu.dot_dimension_numbers<[1], [0], [0], [1], [0, 0, 1, 1], [], []>} : vector<8x32xf32>, vector<32x128xf32>, vector<8x128xf32> -> vector<8x128xf32>
    %80 = arith.addf %17, %79 : vector<8x128xf32>
    %81 = arith.negf %80 : vector<8x128xf32>
    %82 = math.exp %81 : vector<8x128xf32>
    %cst_23 = arith.constant 1.000000e+00 : f32
    %83 = vector.broadcast %cst_23 : f32 to vector<8x128xf32>
    %84 = arith.addf %83, %82 : vector<8x128xf32>
    %85 = arith.divf %83, %84 : vector<8x128xf32>
    %86 = math.tanh %80 : vector<8x128xf32>
    %87 = vector.extract_strided_slice %85 {offsets = [0, 32], sizes = [8, 32], strides = [1, 1]} : vector<8x128xf32> to vector<8x32xf32>
    %88 = arith.mulf %87, %75 : vector<8x32xf32>
    %89 = vector.extract_strided_slice %85 {offsets = [0, 0], sizes = [8, 32], strides = [1, 1]} : vector<8x128xf32> to vector<8x32xf32>
    %90 = vector.extract_strided_slice %86 {offsets = [0, 64], sizes = [8, 32], strides = [1, 1]} : vector<8x128xf32> to vector<8x32xf32>
    %91 = arith.mulf %89, %90 : vector<8x32xf32>
    %92 = arith.addf %88, %91 : vector<8x32xf32>
    %93 = vector.extract_strided_slice %85 {offsets = [0, 96], sizes = [8, 32], strides = [1, 1]} : vector<8x128xf32> to vector<8x32xf32>
    %94 = math.tanh %92 : vector<8x32xf32>
    %95 = arith.mulf %93, %94 : vector<8x32xf32>
    %cst_24 = arith.constant dense<0.000000e+00> : vector<8x128xf32>
    %96 = tpu.matmul %95, %3, %cst_24 {dimension_numbers = #tpu.dot_dimension_numbers<[1], [0], [0], [1], [0, 0, 1, 1], [], []>} : vector<8x32xf32>, vector<32x128xf32>, vector<8x128xf32> -> vector<8x128xf32>
    %97 = arith.addf %23, %96 : vector<8x128xf32>
    %98 = arith.negf %97 : vector<8x128xf32>
    %99 = math.exp %98 : vector<8x128xf32>
    %cst_25 = arith.constant 1.000000e+00 : f32
    %100 = vector.broadcast %cst_25 : f32 to vector<8x128xf32>
    %101 = arith.addf %100, %99 : vector<8x128xf32>
    %102 = arith.divf %100, %101 : vector<8x128xf32>
    %103 = math.tanh %97 : vector<8x128xf32>
    %104 = vector.extract_strided_slice %102 {offsets = [0, 32], sizes = [8, 32], strides = [1, 1]} : vector<8x128xf32> to vector<8x32xf32>
    %105 = arith.mulf %104, %92 : vector<8x32xf32>
    %106 = vector.extract_strided_slice %102 {offsets = [0, 0], sizes = [8, 32], strides = [1, 1]} : vector<8x128xf32> to vector<8x32xf32>
    %107 = vector.extract_strided_slice %103 {offsets = [0, 64], sizes = [8, 32], strides = [1, 1]} : vector<8x128xf32> to vector<8x32xf32>
    %108 = arith.mulf %106, %107 : vector<8x32xf32>
    %109 = arith.addf %105, %108 : vector<8x32xf32>
    %110 = vector.extract_strided_slice %102 {offsets = [0, 96], sizes = [8, 32], strides = [1, 1]} : vector<8x128xf32> to vector<8x32xf32>
    %111 = math.tanh %109 : vector<8x32xf32>
    %112 = arith.mulf %110, %111 : vector<8x32xf32>
    %cst_26 = arith.constant dense<0.000000e+00> : vector<8x128xf32>
    %113 = tpu.matmul %112, %3, %cst_26 {dimension_numbers = #tpu.dot_dimension_numbers<[1], [0], [0], [1], [0, 0, 1, 1], [], []>} : vector<8x32xf32>, vector<32x128xf32>, vector<8x128xf32> -> vector<8x128xf32>
    %114 = arith.addf %29, %113 : vector<8x128xf32>
    %115 = arith.negf %114 : vector<8x128xf32>
    %116 = math.exp %115 : vector<8x128xf32>
    %cst_27 = arith.constant 1.000000e+00 : f32
    %117 = vector.broadcast %cst_27 : f32 to vector<8x128xf32>
    %118 = arith.addf %117, %116 : vector<8x128xf32>
    %119 = arith.divf %117, %118 : vector<8x128xf32>
    %120 = math.tanh %114 : vector<8x128xf32>
    %121 = vector.extract_strided_slice %119 {offsets = [0, 32], sizes = [8, 32], strides = [1, 1]} : vector<8x128xf32> to vector<8x32xf32>
    %122 = arith.mulf %121, %109 : vector<8x32xf32>
    %123 = vector.extract_strided_slice %119 {offsets = [0, 0], sizes = [8, 32], strides = [1, 1]} : vector<8x128xf32> to vector<8x32xf32>
    %124 = vector.extract_strided_slice %120 {offsets = [0, 64], sizes = [8, 32], strides = [1, 1]} : vector<8x128xf32> to vector<8x32xf32>
    %125 = arith.mulf %123, %124 : vector<8x32xf32>
    %126 = arith.addf %122, %125 : vector<8x32xf32>
    %127 = vector.extract_strided_slice %119 {offsets = [0, 96], sizes = [8, 32], strides = [1, 1]} : vector<8x128xf32> to vector<8x32xf32>
    %128 = math.tanh %126 : vector<8x32xf32>
    %129 = arith.mulf %127, %128 : vector<8x32xf32>
    %cst_28 = arith.constant dense<0.000000e+00> : vector<8x128xf32>
    %130 = tpu.matmul %129, %3, %cst_28 {dimension_numbers = #tpu.dot_dimension_numbers<[1], [0], [0], [1], [0, 0, 1, 1], [], []>} : vector<8x32xf32>, vector<32x128xf32>, vector<8x128xf32> -> vector<8x128xf32>
    %131 = arith.addf %35, %130 : vector<8x128xf32>
    %132 = arith.negf %131 : vector<8x128xf32>
    %133 = math.exp %132 : vector<8x128xf32>
    %cst_29 = arith.constant 1.000000e+00 : f32
    %134 = vector.broadcast %cst_29 : f32 to vector<8x128xf32>
    %135 = arith.addf %134, %133 : vector<8x128xf32>
    %136 = arith.divf %134, %135 : vector<8x128xf32>
    %137 = math.tanh %131 : vector<8x128xf32>
    %138 = vector.extract_strided_slice %136 {offsets = [0, 32], sizes = [8, 32], strides = [1, 1]} : vector<8x128xf32> to vector<8x32xf32>
    %139 = arith.mulf %138, %126 : vector<8x32xf32>
    %140 = vector.extract_strided_slice %136 {offsets = [0, 0], sizes = [8, 32], strides = [1, 1]} : vector<8x128xf32> to vector<8x32xf32>
    %141 = vector.extract_strided_slice %137 {offsets = [0, 64], sizes = [8, 32], strides = [1, 1]} : vector<8x128xf32> to vector<8x32xf32>
    %142 = arith.mulf %140, %141 : vector<8x32xf32>
    %143 = arith.addf %139, %142 : vector<8x32xf32>
    %144 = vector.extract_strided_slice %136 {offsets = [0, 96], sizes = [8, 32], strides = [1, 1]} : vector<8x128xf32> to vector<8x32xf32>
    %145 = math.tanh %143 : vector<8x32xf32>
    %146 = arith.mulf %144, %145 : vector<8x32xf32>
    %cst_30 = arith.constant dense<0.000000e+00> : vector<8x128xf32>
    %147 = tpu.matmul %146, %3, %cst_30 {dimension_numbers = #tpu.dot_dimension_numbers<[1], [0], [0], [1], [0, 0, 1, 1], [], []>} : vector<8x32xf32>, vector<32x128xf32>, vector<8x128xf32> -> vector<8x128xf32>
    %148 = arith.addf %41, %147 : vector<8x128xf32>
    %149 = arith.negf %148 : vector<8x128xf32>
    %150 = math.exp %149 : vector<8x128xf32>
    %cst_31 = arith.constant 1.000000e+00 : f32
    %151 = vector.broadcast %cst_31 : f32 to vector<8x128xf32>
    %152 = arith.addf %151, %150 : vector<8x128xf32>
    %153 = arith.divf %151, %152 : vector<8x128xf32>
    %154 = math.tanh %148 : vector<8x128xf32>
    %155 = vector.extract_strided_slice %153 {offsets = [0, 32], sizes = [8, 32], strides = [1, 1]} : vector<8x128xf32> to vector<8x32xf32>
    %156 = arith.mulf %155, %143 : vector<8x32xf32>
    %157 = vector.extract_strided_slice %153 {offsets = [0, 0], sizes = [8, 32], strides = [1, 1]} : vector<8x128xf32> to vector<8x32xf32>
    %158 = vector.extract_strided_slice %154 {offsets = [0, 64], sizes = [8, 32], strides = [1, 1]} : vector<8x128xf32> to vector<8x32xf32>
    %159 = arith.mulf %157, %158 : vector<8x32xf32>
    %160 = arith.addf %156, %159 : vector<8x32xf32>
    %161 = vector.extract_strided_slice %153 {offsets = [0, 96], sizes = [8, 32], strides = [1, 1]} : vector<8x128xf32> to vector<8x32xf32>
    %162 = math.tanh %160 : vector<8x32xf32>
    %163 = arith.mulf %161, %162 : vector<8x32xf32>
    %cst_32 = arith.constant dense<0.000000e+00> : vector<8x128xf32>
    %164 = tpu.matmul %163, %3, %cst_32 {dimension_numbers = #tpu.dot_dimension_numbers<[1], [0], [0], [1], [0, 0, 1, 1], [], []>} : vector<8x32xf32>, vector<32x128xf32>, vector<8x128xf32> -> vector<8x128xf32>
    %165 = arith.addf %47, %164 : vector<8x128xf32>
    %166 = arith.negf %165 : vector<8x128xf32>
    %167 = math.exp %166 : vector<8x128xf32>
    %cst_33 = arith.constant 1.000000e+00 : f32
    %168 = vector.broadcast %cst_33 : f32 to vector<8x128xf32>
    %169 = arith.addf %168, %167 : vector<8x128xf32>
    %170 = arith.divf %168, %169 : vector<8x128xf32>
    %171 = math.tanh %165 : vector<8x128xf32>
    %172 = vector.extract_strided_slice %170 {offsets = [0, 32], sizes = [8, 32], strides = [1, 1]} : vector<8x128xf32> to vector<8x32xf32>
    %173 = arith.mulf %172, %160 : vector<8x32xf32>
    %174 = vector.extract_strided_slice %170 {offsets = [0, 0], sizes = [8, 32], strides = [1, 1]} : vector<8x128xf32> to vector<8x32xf32>
    %175 = vector.extract_strided_slice %171 {offsets = [0, 64], sizes = [8, 32], strides = [1, 1]} : vector<8x128xf32> to vector<8x32xf32>
    %176 = arith.mulf %174, %175 : vector<8x32xf32>
    %177 = arith.addf %173, %176 : vector<8x32xf32>
    %178 = vector.extract_strided_slice %170 {offsets = [0, 96], sizes = [8, 32], strides = [1, 1]} : vector<8x128xf32> to vector<8x32xf32>
    %179 = math.tanh %177 : vector<8x32xf32>
    %180 = arith.mulf %178, %179 : vector<8x32xf32>
    %cst_34 = arith.constant dense<0.000000e+00> : vector<8x128xf32>
    %181 = tpu.matmul %180, %3, %cst_34 {dimension_numbers = #tpu.dot_dimension_numbers<[1], [0], [0], [1], [0, 0, 1, 1], [], []>} : vector<8x32xf32>, vector<32x128xf32>, vector<8x128xf32> -> vector<8x128xf32>
    %182 = arith.addf %53, %181 : vector<8x128xf32>
    %183 = arith.negf %182 : vector<8x128xf32>
    %184 = math.exp %183 : vector<8x128xf32>
    %cst_35 = arith.constant 1.000000e+00 : f32
    %185 = vector.broadcast %cst_35 : f32 to vector<8x128xf32>
    %186 = arith.addf %185, %184 : vector<8x128xf32>
    %187 = arith.divf %185, %186 : vector<8x128xf32>
    %188 = math.tanh %182 : vector<8x128xf32>
    %189 = vector.extract_strided_slice %187 {offsets = [0, 32], sizes = [8, 32], strides = [1, 1]} : vector<8x128xf32> to vector<8x32xf32>
    %190 = arith.mulf %189, %177 : vector<8x32xf32>
    %191 = vector.extract_strided_slice %187 {offsets = [0, 0], sizes = [8, 32], strides = [1, 1]} : vector<8x128xf32> to vector<8x32xf32>
    %192 = vector.extract_strided_slice %188 {offsets = [0, 64], sizes = [8, 32], strides = [1, 1]} : vector<8x128xf32> to vector<8x32xf32>
    %193 = arith.mulf %191, %192 : vector<8x32xf32>
    %194 = arith.addf %190, %193 : vector<8x32xf32>
    %195 = vector.extract_strided_slice %187 {offsets = [0, 96], sizes = [8, 32], strides = [1, 1]} : vector<8x128xf32> to vector<8x32xf32>
    %196 = math.tanh %194 : vector<8x32xf32>
    %197 = arith.mulf %195, %196 : vector<8x32xf32>
    %cst_36 = arith.constant dense<0.000000e+00> : vector<8x128xf32>
    %198 = tpu.matmul %197, %3, %cst_36 {dimension_numbers = #tpu.dot_dimension_numbers<[1], [0], [0], [1], [0, 0, 1, 1], [], []>} : vector<8x32xf32>, vector<32x128xf32>, vector<8x128xf32> -> vector<8x128xf32>
    %199 = arith.addf %59, %198 : vector<8x128xf32>
    %200 = arith.negf %199 : vector<8x128xf32>
    %201 = math.exp %200 : vector<8x128xf32>
    %cst_37 = arith.constant 1.000000e+00 : f32
    %202 = vector.broadcast %cst_37 : f32 to vector<8x128xf32>
    %203 = arith.addf %202, %201 : vector<8x128xf32>
    %204 = arith.divf %202, %203 : vector<8x128xf32>
    %205 = math.tanh %199 : vector<8x128xf32>
    %206 = vector.extract_strided_slice %204 {offsets = [0, 32], sizes = [8, 32], strides = [1, 1]} : vector<8x128xf32> to vector<8x32xf32>
    %207 = arith.mulf %206, %194 : vector<8x32xf32>
    %208 = vector.extract_strided_slice %204 {offsets = [0, 0], sizes = [8, 32], strides = [1, 1]} : vector<8x128xf32> to vector<8x32xf32>
    %209 = vector.extract_strided_slice %205 {offsets = [0, 64], sizes = [8, 32], strides = [1, 1]} : vector<8x128xf32> to vector<8x32xf32>
    %210 = arith.mulf %208, %209 : vector<8x32xf32>
    %211 = arith.addf %207, %210 : vector<8x32xf32>
    %212 = vector.extract_strided_slice %204 {offsets = [0, 96], sizes = [8, 32], strides = [1, 1]} : vector<8x128xf32> to vector<8x32xf32>
    %213 = math.tanh %211 : vector<8x32xf32>
    %214 = arith.mulf %212, %213 : vector<8x32xf32>
    %215 = tpu.concatenate %78, %95, %112, %129, %146, %163, %180, %197, %214 in 0 : vector<8x32xf32>, vector<8x32xf32>, vector<8x32xf32>, vector<8x32xf32>, vector<8x32xf32>, vector<8x32xf32>, vector<8x32xf32>, vector<8x32xf32>, vector<8x32xf32> -> vector<72x32xf32>
    %c0_38 = arith.constant 0 : index
    %c0_39 = arith.constant 0 : index
    %216 = vector.load %arg4[%c0_38, %c0_39] : memref<16x72xf32, #tpu.memory_space<vmem>>, vector<16x72xf32>
    %cst_40 = arith.constant dense<0.000000e+00> : vector<16x32xf32>
    %217 = tpu.matmul %216, %215, %cst_40 {dimension_numbers = #tpu.dot_dimension_numbers<[1], [0], [0], [1], [0, 0, 1, 1], [], []>} : vector<16x72xf32>, vector<72x32xf32>, vector<16x32xf32> -> vector<16x32xf32>
    %cst_41 = arith.constant dense<0.000000e+00> : vector<16x128xf32>
    %218 = tpu.matmul %217, %5, %cst_41 {dimension_numbers = #tpu.dot_dimension_numbers<[1], [0], [0], [1], [0, 0, 1, 1], [], []>} : vector<16x32xf32>, vector<32x128xf32>, vector<16x128xf32> -> vector<16x128xf32>
    %219 = vector.broadcast %1 : vector<1x128xf32> to vector<16x128xf32>
    %220 = arith.addf %218, %219 : vector<16x128xf32>
    %c0_42 = arith.constant 0 : index
    %c0_43 = arith.constant 0 : index
    %221 = vector.load %arg5[%c0_42, %c0_43] : memref<16x128xf32, #tpu.memory_space<vmem>>, vector<16x128xf32>
    tpu.vector_store %arg5[%c0_42, %c0_43], %220 {strides = array<i32>} : memref<16x128xf32, #tpu.memory_space<vmem>>, vector<16x128xf32>,
    return
  }
  func.func @transform_0(%arg0: i32) -> (i32, i32) {
    %c0_i32 = arith.constant 0 : i32
    %c0_i32_0 = arith.constant 0 : i32
    %c0_i32_1 = arith.constant 0 : i32
    return %c0_i32, %c0_i32_0 : i32, i32
  }
  func.func @transform_1(%arg0: i32) -> (i32, i32) {
    %c0_i32 = arith.constant 0 : i32
    %c0_i32_0 = arith.constant 0 : i32
    %c0_i32_1 = arith.constant 0 : i32
    return %c0_i32, %c0_i32_0 : i32, i32
  }
  func.func @transform_2(%arg0: i32) -> (i32, i32) {
    %c0_i32 = arith.constant 0 : i32
    %c0_i32_0 = arith.constant 0 : i32
    %c0_i32_1 = arith.constant 0 : i32
    return %c0_i32, %c0_i32_0 : i32, i32
  }
  func.func @transform_3(%arg0: i32) -> (i32, i32) {
    %c0_i32 = arith.constant 0 : i32
    %c0_i32_0 = arith.constant 0 : i32
    %c0_i32_1 = arith.constant 0 : i32
    return %c0_i32, %c0_i32_0 : i32, i32
  }
  func.func @transform_4(%arg0: i32) -> (i32, i32) {
    %c0_i32 = arith.constant 0 : i32
    %c0_i32_0 = arith.constant 0 : i32
    %c0_i32_1 = arith.constant 0 : i32
    return %c0_i32, %c0_i32_0 : i32, i32
  }
}

</mosaic_0001>

<bundles_post_ra>
// kernel: _decoder_device.1
= control target key start
LH: loop header
LB: loop body
LE: loop exit
PB: predicated region body
PF: predicated region fallthrough
CT: control target
= control target key end

     0   :  { %9 = vsyncpa [#allocation3], 0  ;;  %s2875_s0 = inlined_call_operand.vmem [shape: s32[8,8], index: 0, kind: input, shape index: {}]   ;;  %s2876_s1 = inlined_call_operand.vmem [shape: f32[8,32], index: 1, kind: input, shape index: {}]   ;;  %s2877_s2 = inlined_call_operand.hbm [shape: f32[144,128], index: 2, kind: input, shape index: {}]   ;;  %s2878_s3 = inlined_call_operand.vmem [shape: f32[16,72], index: 3, kind: input, shape index: {}]   ;;  %s2879_s4 = inlined_call_operand.hbm [shape: f32[16,128], index: 4, kind: output, shape index: {}]  }
   0x1   :  { %10 = vsyncpa [#allocation4], 0  ;;  %s2553_s15 = smov [#allocation2]   ;;  %s2505_s19 = scalar_lea.hbm %s2877_s2, 2304 }
   0x2   :  { %s20_s16 = sshll.u32 %s2553_s15, 4  ;;  %p2506_p0 = scmp.ne.s32.totalorder %s2877_s2, %s2505_s19  ;;  %s21_s16 = int_to_ptr.vmem [resolvable:$true] %s20_s16 }
   0x3   :  { %p2509_p1 = scmp.lt.u32.totalorder %s2505_s19, %s2877_s2 }
   0x5   :  { %p2511_p2 = pnand %p2509_p1, %p2506_p0 }
   0x7   :  { %2514 = shalt.err (!%p2511_p2)
}
   0x8   :  { %s2515_s24 = scalar_lea.vmem %s21_s16, 2304  ;;  %p2520_p4 = scmp.lt.s32.totalorder %s21_s16, %s21_s16 }
   0x9   :  { %p2516_p3 = scmp.ne.s32.totalorder %s21_s16, %s2515_s24  ;;  %p2521_p5 = scmp.lt.s32.totalorder %s2515_s24, %s2515_s24 }
   0xb   :  { %p2522_p6 = por %p2521_p5, %p2520_p4 }
   0xd   :  { %p2523_p7 = pnand %p2522_p6, %p2516_p3 }
   0xf   :  { %2526 = shalt.err (!%p2523_p7)
}
  0x10   :  { %s2554_s25 = smov 128   ;;  %s2555_s26 = smov 8  }
  0x11   :  { %26 = dma.hbm_to_vmem [thread:$0]  %s2877_s2, 2304, %s21_s16, [#allocation3], %s2554_s25, %s2554_s25, %s2555_s26  }
  0x12   :  { %2549 = dma.done.wait [#allocation3], 2304  }
  0x13   :  { %2550 = vsyncadd [#allocation3], 4294964992  ;;  %v2556_v0 = vmov 0.0|0.0   ;;  %vm2557_vm0 = vmmov 0   ;;  %v2558_v1 = vmov 0.0   ;;  %v34_v2 = vld [vmem:[#allocation2 + $0x8] sm:$0xff]  ;;  %v53_v36 = vlaneseq }
  0x14   :  { %2257 = vmatprep.subr.bf16.mxu0 %v2556_v0  ;;  %2019 = vmatprep.mubr.msk.f32.mxu0 %vm2557_vm0, %v2558_v1  ;;  %v35_v3 = vld [vmem:[#allocation2 + $0x10] sm:$0xff]  ;;  %v36_v4 = vld [vmem:[#allocation2 + $0x18] sm:$0xff]  ;;  %v37_v6 = vld [vmem:[#allocation2 + $0x20] sm:$0xff]  ;;  %vm59_vm1 = vcmask 261120   ;;  %s2560_s30 = smov 32   ;;  %v2561_v26 = vmov 0  }
  0x15   :  { %2269 = vmatprep.subr.bf16.mxu1 %v2556_v0  ;;  %2041 = vmatprep.mubr.msk.f32.mxu1 %vm2557_vm0, %v2558_v1  ;;  %v2258_v5 = vpack.c.bf16 %v35_v3, %v34_v2  ;;  %v38_v7 = vld [vmem:[#allocation2 + $0x28] sm:$0xff]  ;;  %v39_v8 = vld [vmem:[#allocation2 + $0x30] sm:$0xff]  ;;  %v2261_v9 = vpack.c.bf16 %v37_v6, %v36_v4  ;;  %v40_v11 = vld [vmem:[#allocation2 + $0x38] sm:$0xff]  ;;  %v2659_v41 = vand.u32 127, %v53_v36  ;;  %vm354_vm3 = vcmask 326656   ;;  %s2569_s10 = smov [#allocation5]  }
  0x16   :  { %v2616_v10 = vpack.c.bf16 %v39_v8, %v38_v7  ;;  %v41_v12 = vld [vmem:[#allocation2 + $0x40] sm:$0xff]  ;;  %2425 = vset.pattern.permute.xlu1 %v2561_v26  ;;  %v42_v34 = vld [vmem:[#allocation2 + $0x48] sm:$0xff]  ;;  %v43_v35 = vld [vmem:[#allocation2 + $0x50] sm:$0xff]  ;;  %v2562_v55 = vmov 1   ;;  %vm1670_vm11 = vcmask 588800   ;;  %s1844_s11 = sshll.u32 %s2569_s10, 4  ;;  %s1845_s11 = int_to_ptr.vmem [resolvable:$true] %s1844_s11 }
  0x17   :  { %2259 = vmatpush3.bf16.msra.mxu0 %v2258_v5  ;;  %v52_v13 = vld [vmem:[%s2876_s1] sm:$0xff]  ;;  %v2624_v14 = vpack.c.bf16 %v41_v12, %v40_v11  ;;  %s2559_s1 = smov 64   ;;  %v2653_v37 = vpack.c.bf16 %v43_v35, %v42_v34  ;;  %v44_v38 = vld [vmem:[#allocation2 + $0x58] sm:$0xff]  ;;  %v2670_v44 = vld [vmem:[#allocation2 + $0x68] sm:$0xff]  ;;  %2426 = vset.pattern.permute.xlu0 %v2562_v55  ;;  %v2564_v34 = vmov 3   ;;  %p2532_p9 = scmp.lt.s32.totalorder %s1845_s11, %s1845_s11 }
  0x18   :  { %2260 = vmatprep.subr.bf16.mxu0 %v2556_v0  ;;  %2271 = vmatpush3.bf16.msra.mxu1 %v2616_v10  ;;  %v1856_v15 = vld [vmem:[#allocation2] ss:$0 sm:$0xff] }
  0x19   :  { %2272 = vmatprep.subr.bf16.mxu1 %v2556_v0  ;;  %v2649_v31 = vld [vmem:[%s2875_s0] sm:$0xff] }
  0x1a   :  { %v45_v39 = vld [vmem:[#allocation2 + $0x60] sm:$0xff] }
  0x1b   :  { %2262 = vmatpush3.bf16.msra.mxu0 %v2261_v9  ;;  %v2662_v42 = vpack.c.bf16 %v45_v39, %v44_v38 }
  0x1c   :  { %2263 = vmatprep.subr.bf16.mxu0 %v2556_v0  ;;  %2274 = vmatpush3.bf16.msra.mxu1 %v2624_v14 }
  0x1d   :  { %2275 = vmatprep.subr.bf16.mxu1 %v2556_v0 }
  0x1e   :  { %2020 = vmatmul.mubr.msk.f32.vlgmr.msra.gmra.mrb[0].mxu0 %vm59_vm1, %v52_v13  ;;  %v2563_v13 = vmov 2  }
  0x1f   :  { %2265 = vmatpush3.bf16.msra.mxu0 %v2616_v10  ;;  %2030 = vmatprep.mubr.msk.f32.mxu0 %vm2557_vm0, %v2558_v1 }
  0x20   :  { %2266 = vmatprep.subr.bf16.mxu0 %v2556_v0 }
  0x23   :  { %2268 = vmatpush3.bf16.msra.mxu0 %v2624_v14 }
  0x24   :  { %2281 = vmatprep.subr.bf16.mxu0 %v2556_v0 }
  0x26   :  { %2031 = vmatmul.mubr.f32.vlgmr.msra.gmra.mrb[0].mxu0 %v2558_v1 }
  0x27   :  { %2283 = vmatpush3.bf16.msra.mxu0 %v2616_v10  ;;  %2065 = vmatprep.mubr.msk.f32.mxu0 %vm2557_vm0, %v2558_v1 }
  0x28   :  { %2284 = vmatprep.subr.bf16.mxu0 %v2556_v0 }
  0x2b   :  { %2286 = vmatpush3.bf16.msra.mxu0 %v2624_v14 }
  0x2c   :  { %2287 = vmatprep.subr.bf16.mxu0 %v2556_v0 }
  0xf9   :  { %v250_v16 = vpop.f32.mrb[0].mxu0 }
  0xfa   :  { %v2389_v17 = vadd.f32 %v1856_v15, %v250_v16  ;;  %v2032_v18 = vpop.f32.mrb[1].mxu0 }
  0xfc   :  { %2433 = vtanh.f32 %v2389_v17  ;;  %v1866_v20 = vmul.f32 -1.442695, %v2389_v17 }
  0xfe   :  { %2435 = vpow2.f32 %v1866_v20 }
 0x106   :  { %v2434_v19 = vpop.eup %2433 }
 0x107   :  { %264 = vrot.lane.b32.xlu0 %v2434_v19, %s2559_s1 }
 0x108   :  { %v2436_v21 = vpop.eup %2435 }
 0x109   :  { %v258_v22 = vadd.f32 1.0, %v2436_v21 }
 0x10b   :  { %2437 = vrcp.f32 %v258_v22 }
 0x115   :  { %v2438_v23 = vpop.eup %2437 }
 0x116   :  { %v262_v27 = vmul.f32 0.0, %v2438_v23 }
 0x179   :  { %v265_v24 = vpop.permute.xlu0 %264 }
 0x17a   :  { %v267_v25 = vmul.f32 %v2438_v23, %v265_v24 }
 0x17c   :  { %269 = vrot.lane.b32.xlu0 %v267_v25, %s2560_s30 }
 0x1ee   :  { %v270_v28 = vpop.permute.xlu0 %269 }
 0x1ef   :  { %v272_v29 = vadd.f32 %v270_v28, %v262_v27 }
 0x1f1   :  { %2439 = vtanh.f32 %v272_v29 }
 0x1fb   :  { %v2440_v30 = vpop.eup %2439 }
 0x1fc   :  { %275 = vrot.lane.b32.xlu1 %v2440_v30, %s2559_s1 }
 0x200   :  { %134 = vperm.xlu1 %2425, %v2649_v31  }
 0x26e   :  { %v276_v32 = vpop.permute.xlu1 %275 }
 0x26f   :  { %v278_v33 = vmul.f32 %v2438_v23, %v276_v32 }
 0x271   :  { %280 = vrot.lane.b32.xlu0 %v278_v33, %s2560_s30 }
 0x27f   :  { %v135_v43 = vpop.permute.xlu1 %134 }
 0x280   :  { %vm136_vm2 = vcmp.eq.s32.totalorder %v135_v43, %v2659_v41 }
 0x281   :  { %v1858_v45 = vsel %vm136_vm2, 1.0, %v2558_v1 }
 0x2e3   :  { %v2655_v40 = vpop.permute.xlu0 %280 }
 0x2e4   :  { %2042 = vmatmul.mubr.msk.f32.vlgmr.msra.gmra.mrb[0].mxu1 %vm59_vm1, %v2655_v40 }
 0x2e5   :  { %2277 = vmatpush3.bf16.msra.mxu1 %v2653_v37  ;;  %2054 = vmatprep.mubr.msk.f32.mxu1 %vm2557_vm0, %v2558_v1 }
 0x2e6   :  { %2278 = vmatprep.subr.bf16.mxu1 %v2556_v0 }
 0x2e9   :  { %2280 = vmatpush3.bf16.msra.mxu1 %v2662_v42 }
 0x2ea   :  { %2052 = vmatprep.subr.mxu1 %v2558_v1 }
 0x2ed   :  { %2053 = vmatpush3.msra.mxu1 %v2670_v44 }
 0x2ee   :  { %2055 = vmatmul.mubr.msk.f32.vlgmr.msra.gmra.mrb[0].mxu1 %vm354_vm3, %v1858_v45  ;;  %2293 = vmatprep.subr.bf16.mxu1 %v2556_v0 }
 0x2ef   :  { %2295 = vmatpush3.bf16.msra.mxu1 %v2616_v10  ;;  %2089 = vmatprep.mubr.msk.f32.mxu1 %vm2557_vm0, %v2558_v1 }
 0x2f0   :  { %2296 = vmatprep.subr.bf16.mxu1 %v2556_v0 }
 0x2f3   :  { %2298 = vmatpush3.bf16.msra.mxu1 %v2624_v14 }
 0x2f4   :  { %2299 = vmatprep.subr.bf16.mxu1 %v2556_v0 }
 0x3c1   :  { %v424_v46 = vpop.f32.mrb[0].mxu1 }
 0x3c2   :  { %2441 = vtanh.f32 %v424_v46  ;;  %v2056_v47 = vpop.f32.mrb[1].mxu1  ;;  %v1869_v49 = vmul.f32 -1.442695, %v424_v46 }
 0x3c4   :  { %2443 = vpow2.f32 %v1869_v49 }
 0x3cc   :  { %v2442_v48 = vpop.eup %2441 }
 0x3cd   :  { %437 = vrot.lane.b32.xlu1 %v2442_v48, %s2559_s1 }
 0x3ce   :  { %v2444_v50 = vpop.eup %2443 }
 0x3cf   :  { %v431_v51 = vadd.f32 1.0, %v2444_v50 }
 0x3d1   :  { %2445 = vrcp.f32 %v431_v51 }
 0x3db   :  { %v2446_v52 = vpop.eup %2445 }
 0x3dc   :  { %v435_v56 = vmul.f32 %v2446_v52, %v272_v29 }
 0x43f   :  { %v438_v53 = vpop.permute.xlu1 %437 }
 0x440   :  { %v440_v54 = vmul.f32 %v2446_v52, %v438_v53 }
 0x442   :  { %442 = vrot.lane.b32.xlu0 %v440_v54, %s2560_s30 }
 0x446   :  { %140 = vperm.xlu0 %2426, %v2649_v31  }
 0x44a   :  { %2427 = vset.pattern.permute.xlu0 %v2563_v13 }
 0x4b4   :  { %v443_v57 = vpop.permute.xlu0 %442 }
 0x4b5   :  { %v445_v58 = vadd.f32 %v443_v57, %v435_v56 }
 0x4b7   :  { %2447 = vtanh.f32 %v445_v58 }
 0x4c1   :  { %v2448_v59 = vpop.eup %2447 }
 0x4c2   :  { %448 = vrot.lane.b32.xlu1 %v2448_v59, %s2559_s1 }
 0x4c5   :  { %v141_v63 = vpop.permute.xlu0 %140 }
 0x4c6   :  { %vm142_vm4 = vcmp.eq.s32.totalorder %v141_v63, %v2659_v41 }
 0x4c7   :  { %v1859_v2 = vsel %vm142_vm4, 1.0, %v2558_v1 }
 0x534   :  { %v449_v60 = vpop.permute.xlu1 %448 }
 0x535   :  { %v451_v61 = vmul.f32 %v2446_v52, %v449_v60 }
 0x537   :  { %453 = vrot.lane.b32.xlu1 %v451_v61, %s2560_s30 }
 0x5a9   :  { %v2687_v62 = vpop.permute.xlu1 %453 }
 0x5aa   :  { %2066 = vmatmul.mubr.msk.f32.vlgmr.msra.gmra.mrb[2].mxu0 %vm59_vm1, %v2687_v62 }
 0x5ab   :  { %2289 = vmatpush3.bf16.msra.mxu0 %v2653_v37  ;;  %2078 = vmatprep.mubr.msk.f32.mxu0 %vm2557_vm0, %v2558_v1 }
 0x5ac   :  { %2290 = vmatprep.subr.bf16.mxu0 %v2556_v0 }
 0x5af   :  { %2292 = vmatpush3.bf16.msra.mxu0 %v2662_v42 }
 0x5b0   :  { %2076 = vmatprep.subr.mxu0 %v2558_v1 }
 0x5b3   :  { %2077 = vmatpush3.msra.mxu0 %v2670_v44 }
 0x5b4   :  { %2079 = vmatmul.mubr.msk.f32.vlgmr.msra.gmra.mrb[2].mxu0 %vm354_vm3, %v1859_v2  ;;  %2305 = vmatprep.subr.bf16.mxu0 %v2556_v0 }
 0x5b5   :  { %2307 = vmatpush3.bf16.msra.mxu0 %v2616_v10  ;;  %2113 = vmatprep.mubr.msk.f32.mxu0 %vm2557_vm0, %v2558_v1 }
 0x5b6   :  { %2308 = vmatprep.subr.bf16.mxu0 %v2556_v0 }
 0x5b9   :  { %2310 = vmatpush3.bf16.msra.mxu0 %v2624_v14 }
 0x5ba   :  { %2311 = vmatprep.subr.bf16.mxu0 %v2556_v0 }
 0x687   :  { %v596_v3 = vpop.f32.mrb[2].mxu0 }
 0x688   :  { %2449 = vtanh.f32 %v596_v3  ;;  %v2080_v4 = vpop.f32.mrb[3].mxu0  ;;  %v1872_v6 = vmul.f32 -1.442695, %v596_v3 }
 0x68a   :  { %2451 = vpow2.f32 %v1872_v6 }
 0x692   :  { %v2450_v5 = vpop.eup %2449 }
 0x693   :  { %609 = vrot.lane.b32.xlu1 %v2450_v5, %s2559_s1 }
 0x694   :  { %v2452_v7 = vpop.eup %2451 }
 0x695   :  { %v603_v8 = vadd.f32 1.0, %v2452_v7 }
 0x697   :  { %2453 = vrcp.f32 %v603_v8 }
 0x6a1   :  { %v2454_v9 = vpop.eup %2453 }
 0x6a2   :  { %v607_v15 = vmul.f32 %v2454_v9, %v445_v58  ;;  %v2565_v58 = vmov 4  }
 0x705   :  { %v610_v11 = vpop.permute.xlu1 %609 }
 0x706   :  { %v612_v12 = vmul.f32 %v2454_v9, %v610_v11 }
 0x708   :  { %614 = vrot.lane.b32.xlu0 %v612_v12, %s2560_s30 }
 0x70c   :  { %146 = vperm.xlu0 %2427, %v2649_v31  }
 0x710   :  { %2428 = vset.pattern.permute.xlu0 %v2564_v34 }
 0x77a   :  { %v615_v16 = vpop.permute.xlu0 %614 }
 0x77b   :  { %v617_v17 = vadd.f32 %v615_v16, %v607_v15 }
 0x77d   :  { %2455 = vtanh.f32 %v617_v17 }
 0x787   :  { %v2456_v18 = vpop.eup %2455 }
 0x788   :  { %620 = vrot.lane.b32.xlu1 %v2456_v18, %s2559_s1  ;;  %v2566_v18 = vmov 5  }
 0x78b   :  { %v147_v22 = vpop.permute.xlu0 %146 }
 0x78c   :  { %vm148_vm5 = vcmp.eq.s32.totalorder %v147_v22, %v2659_v41 }
 0x78d   :  { %v1860_v23 = vsel %vm148_vm5, 1.0, %v2558_v1 }
 0x7fa   :  { %v621_v19 = vpop.permute.xlu1 %620 }
 0x7fb   :  { %v623_v20 = vmul.f32 %v2454_v9, %v621_v19 }
 0x7fd   :  { %625 = vrot.lane.b32.xlu1 %v623_v20, %s2560_s30 }
 0x86f   :  { %v2713_v21 = vpop.permute.xlu1 %625 }
 0x870   :  { %2090 = vmatmul.mubr.msk.f32.vlgmr.msra.gmra.mrb[2].mxu1 %vm59_vm1, %v2713_v21 }
 0x871   :  { %2301 = vmatpush3.bf16.msra.mxu1 %v2653_v37  ;;  %2102 = vmatprep.mubr.msk.f32.mxu1 %vm2557_vm0, %v2558_v1 }
 0x872   :  { %2302 = vmatprep.subr.bf16.mxu1 %v2556_v0 }
 0x875   :  { %2304 = vmatpush3.bf16.msra.mxu1 %v2662_v42 }
 0x876   :  { %2100 = vmatprep.subr.mxu1 %v2558_v1 }
 0x879   :  { %2101 = vmatpush3.msra.mxu1 %v2670_v44 }
 0x87a   :  { %2103 = vmatmul.mubr.msk.f32.vlgmr.msra.gmra.mrb[2].mxu1 %vm354_vm3, %v1860_v23  ;;  %2317 = vmatprep.subr.bf16.mxu1 %v2556_v0 }
 0x87b   :  { %2319 = vmatpush3.bf16.msra.mxu1 %v2616_v10  ;;  %2137 = vmatprep.mubr.msk.f32.mxu1 %vm2557_vm0, %v2558_v1 }
 0x87c   :  { %2320 = vmatprep.subr.bf16.mxu1 %v2556_v0 }
 0x87f   :  { %2322 = vmatpush3.bf16.msra.mxu1 %v2624_v14 }
 0x880   :  { %2323 = vmatprep.subr.bf16.mxu1 %v2556_v0 }
 0x94d   :  { %v768_v24 = vpop.f32.mrb[2].mxu1 }
 0x94e   :  { %2457 = vtanh.f32 %v768_v24  ;;  %v2104_v25 = vpop.f32.mrb[3].mxu1  ;;  %v1875_v27 = vmul.f32 -1.442695, %v768_v24 }
 0x950   :  { %2459 = vpow2.f32 %v1875_v27 }
 0x958   :  { %v2458_v26 = vpop.eup %2457 }
 0x959   :  { %781 = vrot.lane.b32.xlu1 %v2458_v26, %s2559_s1 }
 0x95a   :  { %v2460_v28 = vpop.eup %2459 }
 0x95b   :  { %v775_v29 = vadd.f32 1.0, %v2460_v28 }
 0x95d   :  { %2461 = vrcp.f32 %v775_v29 }
 0x967   :  { %v2462_v30 = vpop.eup %2461 }
 0x968   :  { %v779_v35 = vmul.f32 %v2462_v30, %v617_v17 }
 0x9cb   :  { %v782_v32 = vpop.permute.xlu1 %781 }
 0x9cc   :  { %v784_v33 = vmul.f32 %v2462_v30, %v782_v32 }
 0x9ce   :  { %786 = vrot.lane.b32.xlu0 %v784_v33, %s2560_s30 }
 0x9d2   :  { %152 = vperm.xlu0 %2428, %v2649_v31  }
 0x9d6   :  { %2429 = vset.pattern.permute.xlu0 %v2565_v58 }
 0xa40   :  { %v787_v36 = vpop.permute.xlu0 %786 }
 0xa41   :  { %v789_v38 = vadd.f32 %v787_v36, %v779_v35 }
 0xa43   :  { %2463 = vtanh.f32 %v789_v38 }
 0xa4d   :  { %v2464_v39 = vpop.eup %2463 }
 0xa4e   :  { %792 = vrot.lane.b32.xlu1 %v2464_v39, %s2559_s1  ;;  %v2567_v39 = vmov 6  }
 0xa51   :  { %v153_v47 = vpop.permute.xlu0 %152 }
 0xa52   :  { %vm154_vm6 = vcmp.eq.s32.totalorder %v153_v47, %v2659_v41 }
 0xa53   :  { %v1861_v48 = vsel %vm154_vm6, 1.0, %v2558_v1 }
 0xac0   :  { %v793_v43 = vpop.permute.xlu1 %792 }
 0xac1   :  { %v795_v45 = vmul.f32 %v2462_v30, %v793_v43 }
 0xac3   :  { %797 = vrot.lane.b32.xlu1 %v795_v45, %s2560_s30 }
 0xb35   :  { %v2739_v46 = vpop.permute.xlu1 %797 }
 0xb36   :  { %2114 = vmatmul.mubr.msk.f32.vlgmr.msra.gmra.mrb[4].mxu0 %vm59_vm1, %v2739_v46 }
 0xb37   :  { %2313 = vmatpush3.bf16.msra.mxu0 %v2653_v37  ;;  %2126 = vmatprep.mubr.msk.f32.mxu0 %vm2557_vm0, %v2558_v1 }
 0xb38   :  { %2314 = vmatprep.subr.bf16.mxu0 %v2556_v0 }
 0xb3b   :  { %2316 = vmatpush3.bf16.msra.mxu0 %v2662_v42 }
 0xb3c   :  { %2124 = vmatprep.subr.mxu0 %v2558_v1 }
 0xb3f   :  { %2125 = vmatpush3.msra.mxu0 %v2670_v44 }
 0xb40   :  { %2127 = vmatmul.mubr.msk.f32.vlgmr.msra.gmra.mrb[4].mxu0 %vm354_vm3, %v1861_v48  ;;  %2329 = vmatprep.subr.bf16.mxu0 %v2556_v0 }
 0xb41   :  { %2331 = vmatpush3.bf16.msra.mxu0 %v2616_v10  ;;  %2161 = vmatprep.mubr.msk.f32.mxu0 %vm2557_vm0, %v2558_v1 }
 0xb42   :  { %2332 = vmatprep.subr.bf16.mxu0 %v2556_v0 }
 0xb45   :  { %2334 = vmatpush3.bf16.msra.mxu0 %v2624_v14 }
 0xb46   :  { %2335 = vmatprep.subr.bf16.mxu0 %v2556_v0 }
 0xc13   :  { %v940_v49 = vpop.f32.mrb[4].mxu0 }
 0xc14   :  { %2465 = vtanh.f32 %v940_v49  ;;  %v2128_v50 = vpop.f32.mrb[5].mxu0  ;;  %v1878_v52 = vmul.f32 -1.442695, %v940_v49 }
 0xc16   :  { %2467 = vpow2.f32 %v1878_v52 }
 0xc1e   :  { %v2466_v51 = vpop.eup %2465 }
 0xc1f   :  { %953 = vrot.lane.b32.xlu1 %v2466_v51, %s2559_s1 }
 0xc20   :  { %v2468_v53 = vpop.eup %2467 }
 0xc21   :  { %v947_v54 = vadd.f32 1.0, %v2468_v53  ;;  %v2365_v53 = vpack.c.bf16 %v2687_v62, %v2655_v40 }
 0xc23   :  { %2469 = vrcp.f32 %v947_v54  ;;  %v2369_v54 = vpack.c.bf16 %v2739_v46, %v2713_v21 }
 0xc2d   :  { %v2470_v55 = vpop.eup %2469 }
 0xc2e   :  { %v951_v59 = vmul.f32 %v2470_v55, %v789_v38 }
 0xc91   :  { %v954_v56 = vpop.permute.xlu1 %953 }
 0xc92   :  { %v956_v57 = vmul.f32 %v2470_v55, %v954_v56 }
 0xc94   :  { %958 = vrot.lane.b32.xlu0 %v956_v57, %s2560_s30 }
 0xc98   :  { %158 = vperm.xlu0 %2429, %v2649_v31  }
 0xc9c   :  { %2430 = vset.pattern.permute.xlu0 %v2566_v18 }
 0xd06   :  { %v959_v60 = vpop.permute.xlu0 %958 }
 0xd07   :  { %v961_v61 = vadd.f32 %v959_v60, %v951_v59 }
 0xd09   :  { %2471 = vtanh.f32 %v961_v61 }
 0xd13   :  { %v2472_v63 = vpop.eup %2471 }
 0xd14   :  { %964 = vrot.lane.b32.xlu1 %v2472_v63, %s2559_s1 }
 0xd17   :  { %v159_v5 = vpop.permute.xlu0 %158 }
 0xd18   :  { %vm160_vm7 = vcmp.eq.s32.totalorder %v159_v5, %v2659_v41 }
 0xd19   :  { %v1862_v6 = vsel %vm160_vm7, 1.0, %v2558_v1 }
 0xd86   :  { %v965_v2 = vpop.permute.xlu1 %964 }
 0xd87   :  { %v967_v3 = vmul.f32 %v2470_v55, %v965_v2 }
 0xd89   :  { %969 = vrot.lane.b32.xlu1 %v967_v3, %s2560_s30 }
 0xdfb   :  { %v2765_v4 = vpop.permute.xlu1 %969 }
 0xdfc   :  { %2138 = vmatmul.mubr.msk.f32.vlgmr.msra.gmra.mrb[4].mxu1 %vm59_vm1, %v2765_v4 }
 0xdfd   :  { %2325 = vmatpush3.bf16.msra.mxu1 %v2653_v37  ;;  %2150 = vmatprep.mubr.msk.f32.mxu1 %vm2557_vm0, %v2558_v1 }
 0xdfe   :  { %2326 = vmatprep.subr.bf16.mxu1 %v2556_v0 }
 0xe01   :  { %2328 = vmatpush3.bf16.msra.mxu1 %v2662_v42 }
 0xe02   :  { %2148 = vmatprep.subr.mxu1 %v2558_v1 }
 0xe05   :  { %2149 = vmatpush3.msra.mxu1 %v2670_v44 }
 0xe06   :  { %2151 = vmatmul.mubr.msk.f32.vlgmr.msra.gmra.mrb[4].mxu1 %vm354_vm3, %v1862_v6  ;;  %2341 = vmatprep.subr.bf16.mxu1 %v2556_v0 }
 0xe07   :  { %2343 = vmatpush3.bf16.msra.mxu1 %v2616_v10  ;;  %2185 = vmatprep.mubr.msk.f32.mxu1 %vm2557_vm0, %v2558_v1 }
 0xe08   :  { %2344 = vmatprep.subr.bf16.mxu1 %v2556_v0 }
 0xe0b   :  { %2346 = vmatpush3.bf16.msra.mxu1 %v2624_v14 }
 0xe0c   :  { %2347 = vmatprep.subr.bf16.mxu1 %v2556_v0 }
 0xed9   :  { %v1112_v7 = vpop.f32.mrb[4].mxu1 }
 0xeda   :  { %2473 = vtanh.f32 %v1112_v7  ;;  %v2152_v8 = vpop.f32.mrb[5].mxu1  ;;  %v1881_v11 = vmul.f32 -1.442695, %v1112_v7 }
 0xedc   :  { %2475 = vpow2.f32 %v1881_v11 }
 0xee4   :  { %v2474_v9 = vpop.eup %2473 }
 0xee5   :  { %1125 = vrot.lane.b32.xlu1 %v2474_v9, %s2559_s1 }
 0xee6   :  { %v2476_v12 = vpop.eup %2475 }
 0xee7   :  { %v1119_v13 = vadd.f32 1.0, %v2476_v12 }
 0xee9   :  { %2477 = vrcp.f32 %v1119_v13 }
 0xef3   :  { %v2478_v15 = vpop.eup %2477 }
 0xef4   :  { %v1123_v19 = vmul.f32 %v2478_v15, %v961_v61  ;;  %v2568_v61 = vmov 7  }
 0xf57   :  { %v1126_v16 = vpop.permute.xlu1 %1125 }
 0xf58   :  { %v1128_v17 = vmul.f32 %v2478_v15, %v1126_v16 }
 0xf5a   :  { %1130 = vrot.lane.b32.xlu0 %v1128_v17, %s2560_s30 }
 0xf5e   :  { %164 = vperm.xlu0 %2430, %v2649_v31  }
 0xf62   :  { %2431 = vset.pattern.permute.xlu0 %v2567_v39 }
 0xfcc   :  { %v1131_v20 = vpop.permute.xlu0 %1130 }
 0xfcd   :  { %v1133_v22 = vadd.f32 %v1131_v20, %v1123_v19  ;;  %v1656_v19 = vld [vmem:[%s2878_s3] sm:$0xff]  ;;  %v47_v20 = vld [vmem:[#allocation2 + $0x70] sm:$0xff] }
 0xfcf   :  { %2479 = vtanh.f32 %v1133_v22 }
 0xfd9   :  { %v2480_v23 = vpop.eup %2479 }
 0xfda   :  { %1136 = vrot.lane.b32.xlu1 %v2480_v23, %s2559_s1  ;;  %v49_v23 = vld [vmem:[#allocation2 + $0x80] sm:$0xff] }
 0xfdd   :  { %v165_v27 = vpop.permute.xlu0 %164 }
 0xfde   :  { %vm166_vm8 = vcmp.eq.s32.totalorder %v165_v27, %v2659_v41 }
 0xfdf   :  { %v1863_v28 = vsel %vm166_vm8, 1.0, %v2558_v1 }
0x104c   :  { %v1137_v24 = vpop.permute.xlu1 %1136 }
0x104d   :  { %v1139_v25 = vmul.f32 %v2478_v15, %v1137_v24 }
0x104f   :  { %1141 = vrot.lane.b32.xlu1 %v1139_v25, %s2560_s30  ;;  %v50_v25 = vld [vmem:[#allocation2 + $0x88] sm:$0xff] }
0x10c1   :  { %v1142_v26 = vpop.permute.xlu1 %1141 }
0x10c2   :  { %2162 = vmatmul.mubr.msk.f32.vlgmr.msra.gmra.mrb[6].mxu0 %vm59_vm1, %v1142_v26  ;;  %v2373_v55 = vpack.c.bf16 %v1142_v26, %v2765_v4  ;;  %v2385_v26 = vpack.c.bf16 %v50_v25, %v49_v23 }
0x10c3   :  { %2337 = vmatpush3.bf16.msra.mxu0 %v2653_v37  ;;  %2174 = vmatprep.mubr.msk.f32.mxu0 %vm2557_vm0, %v2558_v1 }
0x10c4   :  { %2338 = vmatprep.subr.bf16.mxu0 %v2556_v0 }
0x10c7   :  { %2340 = vmatpush3.bf16.msra.mxu0 %v2662_v42 }
0x10c8   :  { %2172 = vmatprep.subr.mxu0 %v2558_v1 }
0x10cb   :  { %2173 = vmatpush3.msra.mxu0 %v2670_v44 }
0x10cc   :  { %2175 = vmatmul.mubr.msk.f32.vlgmr.msra.gmra.mrb[6].mxu0 %vm354_vm3, %v1863_v28  ;;  %2353 = vmatprep.subr.bf16.mxu0 %v2556_v0 }
0x10cd   :  { %2355 = vmatpush3.bf16.msra.mxu0 %v2616_v10  ;;  %2209 = vmatprep.mubr.msk.f32.mxu0 %vm2557_vm0, %v2558_v1 }
0x10ce   :  { %2356 = vmatprep.subr.bf16.mxu0 %v2556_v0 }
0x10d1   :  { %2358 = vmatpush3.bf16.msra.mxu0 %v2624_v14 }
0x10d2   :  { %2359 = vmatprep.subr.bf16.mxu0 %v2556_v0 }
0x119f   :  { %v1284_v29 = vpop.f32.mrb[6].mxu0 }
0x11a0   :  { %2481 = vtanh.f32 %v1284_v29  ;;  %v2176_v30 = vpop.f32.mrb[7].mxu0  ;;  %v1884_v33 = vmul.f32 -1.442695, %v1284_v29 }
0x11a1   :  { %v1657_v30 = vld [vmem:[%s2878_s3 + $0x8] sm:$0xff]  ;;  %s2527_s3 = scalar_lea.vmem %s1845_s11, 256 }
0x11a2   :  { %2483 = vpow2.f32 %v1884_v33  ;;  %p2528_p8 = scmp.ne.s32.totalorder %s1845_s11, %s2527_s3  ;;  %p2533_p10 = scmp.lt.s32.totalorder %s2527_s3, %s2527_s3 }
0x11a4   :  { %p2534_p11 = por %p2533_p10, %p2532_p9 }
0x11a6   :  { %p2535_p12 = pnand %p2534_p11, %p2528_p8 }
0x11aa   :  { %v2482_v32 = vpop.eup %2481 }
0x11ab   :  { %1297 = vrot.lane.b32.xlu1 %v2482_v32, %s2559_s1 }
0x11ac   :  { %v2484_v34 = vpop.eup %2483 }
0x11ad   :  { %v1291_v35 = vadd.f32 1.0, %v2484_v34  ;;  %v1893_v34 = vld [vmem:[#allocation2 + $0x1] ss:$0 sm:$0xff] }
0x11af   :  { %2485 = vrcp.f32 %v1291_v35 }
0x11b9   :  { %v2486_v10 = vpop.eup %2485 }
0x11ba   :  { %v1295_v14 = vmul.f32 %v2486_v10, %v1133_v22  ;;  %v48_v22 = vld [vmem:[#allocation2 + $0x78] sm:$0xff] }
0x11bb   :  { %v2381_v24 = vpack.c.bf16 %v48_v22, %v47_v20 }
0x121d   :  { %v1298_v36 = vpop.permute.xlu1 %1297 }
0x121e   :  { %v1300_v38 = vmul.f32 %v2486_v10, %v1298_v36 }
0x1220   :  { %1302 = vrot.lane.b32.xlu0 %v1300_v38, %s2560_s30 }
0x1224   :  { %170 = vperm.xlu0 %2431, %v2649_v31  }
0x1228   :  { %2432 = vset.pattern.permute.xlu0 %v2568_v61 }
0x1292   :  { %v1303_v43 = vpop.permute.xlu0 %1302 }
0x1293   :  { %v1305_v45 = vadd.f32 %v1303_v43, %v1295_v14 }
0x1295   :  { %2487 = vtanh.f32 %v1305_v45 }
0x129f   :  { %v2488_v47 = vpop.eup %2487 }
0x12a0   :  { %1308 = vrot.lane.b32.xlu1 %v2488_v47, %s2559_s1 }
0x12a3   :  { %v171_v51 = vpop.permute.xlu0 %170 }
0x12a4   :  { %vm172_vm9 = vcmp.eq.s32.totalorder %v171_v51, %v2659_v41 }
0x12a5   :  { %v1864_v52 = vsel %vm172_vm9, 1.0, %v2558_v1 }
0x1312   :  { %v1309_v48 = vpop.permute.xlu1 %1308 }
0x1313   :  { %v1311_v49 = vmul.f32 %v2486_v10, %v1309_v48 }
0x1315   :  { %1313 = vrot.lane.b32.xlu1 %v1311_v49, %s2560_s30 }
0x1387   :  { %v1314_v50 = vpop.permute.xlu1 %1313 }
0x1388   :  { %2186 = vmatmul.mubr.msk.f32.vlgmr.msra.gmra.mrb[6].mxu1 %vm59_vm1, %v1314_v50 }
0x1389   :  { %2349 = vmatpush3.bf16.msra.mxu1 %v2653_v37  ;;  %2198 = vmatprep.mubr.msk.f32.mxu1 %vm2557_vm0, %v2558_v1 }
0x138a   :  { %2350 = vmatprep.subr.bf16.mxu1 %v2556_v0 }
0x138d   :  { %2352 = vmatpush3.bf16.msra.mxu1 %v2662_v42 }
0x138e   :  { %2196 = vmatprep.subr.mxu1 %v2558_v1 }
0x1391   :  { %2197 = vmatpush3.msra.mxu1 %v2670_v44 }
0x1392   :  { %2199 = vmatmul.mubr.msk.f32.vlgmr.msra.gmra.mrb[6].mxu1 %vm354_vm3, %v1864_v52  ;;  %2366 = vmatprep.subr.bf16.mxu1 %v2365_v53 }
0x1393   :  { %2368 = vmatpush3.bf16.msra.mxu1 %v2365_v53  ;;  %2243 = vmatprep.mubr.msk.f32.mxu1 %vm1670_vm11, %v1656_v19 }
0x1394   :  { %2370 = vmatprep.subr.bf16.mxu1 %v2369_v54 }
0x1397   :  { %2372 = vmatpush3.bf16.msra.mxu1 %v2369_v54 }
0x1398   :  { %2374 = vmatprep.subr.bf16.mxu1 %v2373_v55 }
0x139b   :  { %2376 = vmatpush3.bf16.msra.mxu1 %v2373_v55 }
0x1465   :  { %v1456_v56 = vpop.f32.mrb[6].mxu1 }
0x1466   :  { %2489 = vtanh.f32 %v1456_v56  ;;  %v2200_v57 = vpop.f32.mrb[7].mxu1  ;;  %v1887_v40 = vmul.f32 -1.442695, %v1456_v56 }
0x1468   :  { %2491 = vpow2.f32 %v1887_v40 }
0x1470   :  { %v2490_v58 = vpop.eup %2489 }
0x1471   :  { %1469 = vrot.lane.b32.xlu1 %v2490_v58, %s2559_s1 }
0x1472   :  { %v2492_v62 = vpop.eup %2491 }
0x1473   :  { %v1463_v21 = vadd.f32 1.0, %v2492_v62 }
0x1475   :  { %2493 = vrcp.f32 %v1463_v21 }
0x147f   :  { %v2494_v46 = vpop.eup %2493 }
0x1480   :  { %v1467_v63 = vmul.f32 %v2494_v46, %v1305_v45 }
0x14e3   :  { %v1470_v59 = vpop.permute.xlu1 %1469 }
0x14e4   :  { %v1472_v60 = vmul.f32 %v2494_v46, %v1470_v59 }
0x14e6   :  { %1474 = vrot.lane.b32.xlu0 %v1472_v60, %s2560_s30 }
0x14ea   :  { %176 = vperm.xlu0 %2432, %v2649_v31  }
0x1558   :  { %v1475_v2 = vpop.permute.xlu0 %1474 }
0x1559   :  { %v1477_v3 = vadd.f32 %v1475_v2, %v1467_v63 }
0x155b   :  { %2495 = vtanh.f32 %v1477_v3 }
0x1565   :  { %v2496_v4 = vpop.eup %2495 }
0x1566   :  { %1480 = vrot.lane.b32.xlu1 %v2496_v4, %s2559_s1 }
0x1569   :  { %v177_v9 = vpop.permute.xlu0 %176 }
0x156a   :  { %vm178_vm10 = vcmp.eq.s32.totalorder %v177_v9, %v2659_v41 }
0x156b   :  { %v1865_v31 = vsel %vm178_vm10, 1.0, %v2558_v1 }
0x15d8   :  { %v1481_v5 = vpop.permute.xlu1 %1480 }
0x15d9   :  { %v1483_v6 = vmul.f32 %v2494_v46, %v1481_v5 }
0x15db   :  { %1485 = vrot.lane.b32.xlu1 %v1483_v6, %s2560_s30 }
0x164d   :  { %v1486_v7 = vpop.permute.xlu1 %1485 }
0x164e   :  { %v2377_v8 = vpack.c.bf16 %v1486_v7, %v1314_v50  ;;  %2210 = vmatmul.mubr.msk.f32.vlgmr.msra.gmra.mrb[8].mxu0 %vm59_vm1, %v1486_v7 }
0x164f   :  { %2361 = vmatpush3.bf16.msra.mxu0 %v2653_v37  ;;  %2222 = vmatprep.mubr.msk.f32.mxu0 %vm2557_vm0, %v2558_v1 }
0x1650   :  { %2378 = vmatprep.subr.bf16.mxu1 %v2377_v8  ;;  %2362 = vmatprep.subr.bf16.mxu0 %v2556_v0 }
0x1651   :  { %2380 = vmatpush3.bf16.msra.mxu1 %v2377_v8 }
0x1653   :  { %2364 = vmatpush3.bf16.msra.mxu0 %v2662_v42 }
0x1654   :  { %2220 = vmatprep.subr.mxu0 %v2558_v1 }
0x1657   :  { %2221 = vmatpush3.msra.mxu0 %v2670_v44 }
0x1658   :  { %2223 = vmatmul.mubr.msk.f32.vlgmr.msra.gmra.mrb[8].mxu0 %vm354_vm3, %v1865_v31  ;;  %2382 = vmatprep.subr.bf16.mxu0 %v2381_v24 }
0x1659   :  { %2384 = vmatpush3.bf16.msra.mxu0 %v2381_v24 }
0x165a   :  { %2386 = vmatprep.subr.bf16.mxu0 %v2385_v26 }
0x165d   :  { %2388 = vmatpush3.bf16.msra.mxu0 %v2385_v26 }
0x172b   :  { %v1628_v37 = vpop.f32.mrb[8].mxu0 }
0x172c   :  { %2497 = vtanh.f32 %v1628_v37  ;;  %v2224_v11 = vpop.f32.mrb[9].mxu0  ;;  %v1890_v0 = vmul.f32 -1.442695, %v1628_v37 }
0x172e   :  { %2499 = vpow2.f32 %v1890_v0 }
0x1736   :  { %v2498_v12 = vpop.eup %2497 }
0x1737   :  { %1641 = vrot.lane.b32.xlu1 %v2498_v12, %s2559_s1 }
0x1738   :  { %v2500_v13 = vpop.eup %2499 }
0x1739   :  { %v1635_v41 = vadd.f32 1.0, %v2500_v13 }
0x173b   :  { %2501 = vrcp.f32 %v1635_v41 }
0x1745   :  { %v2502_v42 = vpop.eup %2501 }
0x1746   :  { %v1639_v1 = vmul.f32 %v2502_v42, %v1477_v3 }
0x17a9   :  { %v1642_v15 = vpop.permute.xlu1 %1641 }
0x17aa   :  { %v1644_v16 = vmul.f32 %v2502_v42, %v1642_v15 }
0x17ac   :  { %1646 = vrot.lane.b32.xlu0 %v1644_v16, %s2560_s30 }
0x181e   :  { %v1647_v44 = vpop.permute.xlu0 %1646 }
0x181f   :  { %v1649_v17 = vadd.f32 %v1647_v44, %v1639_v1 }
0x1821   :  { %2503 = vtanh.f32 %v1649_v17 }
0x182b   :  { %v2504_v18 = vpop.eup %2503 }
0x182c   :  { %1652 = vrot.lane.b32.xlu1 %v2504_v18, %s2559_s1 }
0x189e   :  { %v1653_v27 = vpop.permute.xlu1 %1652 }
0x189f   :  { %v1655_v28 = vmul.f32 %v2502_v42, %v1653_v27 }
0x18a1   :  { %1659 = vrot.lane.b32.xlu0 %v1655_v28, %s2560_s30 }
0x1913   :  { %v1660_v29 = vpop.permute.xlu0 %1659 }
0x1914   :  { %2241 = vmatprep.subr.mxu1 %v1660_v29 }
0x1915   :  { %2242 = vmatpush3.msra.mxu1 %v1660_v29 }
0x1916   :  { %2244 = vmatmul.mubr.msk.f32.vlgmr.msra.gmra.mrb[8].mxu1 %vm1670_vm11, %v1657_v30 }
0x19e9   :  { %v2245_v32 = vpop.f32.mrb[8].mxu1 }
0x19ea   :  { %v1743_v33 = vpop.f32.mrb[9].mxu1 }
0x19eb   :  { %2254 = vmatprep.mubr.msk.f32.mxu0 %vm59_vm1, %v1743_v33 }
0x19ec   :  { %2255 = vmatmul.mubr.msk.f32.vlgmr.msra.gmra.mrb[10].mxu0 %vm59_vm1, %v2245_v32 }
0x1abf   :  { %v2256_v35 = vpop.f32.mrb[10].mxu0 }
0x1ac0   :  { %v1834_v10 = vadd.f32 %v2256_v35, %v1893_v34  ;;  %v1828_v36 = vpop.f32.mrb[11].mxu0 }
0x1ac1   :  { %v1829_v38 = vadd.f32 %v1893_v34, %v1828_v36 }
0x1ac2   :  { %1838 = vst [vmem:[#allocation5 + $0x8] sm:$0xff] %v1834_v10 }
0x1ac3   :  { %1837 = vst [vmem:[#allocation5] sm:$0xff] %v1829_v38 }
0x1ac4   :  { %2538 = shalt.err (!%p2535_p12)
}
0x1ac5   :  { %s2539_s14 = scalar_lea.hbm %s2879_s4, 256 }
0x1ac6   :  { %p2540_p13 = scmp.ne.s32.totalorder %s2879_s4, %s2539_s14  ;;  %p2543_p0 = scmp.lt.u32.totalorder %s2539_s14, %s2879_s4 }
0x1ac8   :  { %p2545_p1 = pnand %p2543_p0, %p2540_p13 }
0x1aca   :  { %2548 = shalt.err (!%p2545_p1)
}
0x1acb   :  { %1850 = dma.vmem_to_hbm [thread:$0]  %s1845_s11, 256, %s2879_s4, [#allocation4], %s2554_s25, %s2554_s25, %s2555_s26  }
0x1acc   :  { %2551 = dma.done.wait [#allocation4], 256  }
0x1acd   :  { %2552 = vsyncadd [#allocation4], 4294967040 }
0x1ace   :  { %1854 = vsyncpa [#allocation3], 1 }
0x1acf   :  { %1855 = vsyncpa [#allocation4], 1 }

</bundles_post_ra>
